<compile_context>
chip_gen: v7x
topology: tpu7x:2x2x1
jax: 0.10.0
libtpu: 0.0.40
codegen_flags: <defaults>
</compile_context>

<pallas_src>
import jax
import jax.numpy as jnp
from jax.experimental import pallas as pl
from jax.experimental.pallas import tpu as pltpu


def _value_head_resident_kernel(x_ref, w1_ref, b1_ref, w2_ref, b2_ref, o_ref):
    # x_ref: (tm, H) input dtype (pipelined row tile)
    # w1_ref: (H, H) compute dtype, whole-array VMEM (resident, single-buffered)
    # b1_ref/w2_ref: (1, H) f32, whole-array VMEM     b2_ref: (1,) f32 SMEM
    # o_ref: (tm, 1)
    w1 = w1_ref[...]
    b1 = b1_ref[...]
    w2 = w2_ref[...]
    b2 = b2_ref[0]
    tm = x_ref.shape[0]
    half = tm // 2
    # Two independent sub-tiles: sub-tile 1's MXU work overlaps sub-tile 0's VALU epilogue.
    for s in range(2):
        r0 = s * half
        x = x_ref[pl.ds(r0, half), :].astype(w1.dtype)                 # in-kernel cast for MXU
        h = jnp.dot(x, w1, preferred_element_type=jnp.float32)         # MXU, f32 accumulate
        h = jnp.maximum(h + b1, 0.0)                                   # bias + ReLU (VPU)
        v = jnp.sum(h * w2, axis=-1, keepdims=True)                    # Linear(H,1): VPU + XLU
        o_ref[pl.ds(r0, half), :] = (v + b2).astype(o_ref.dtype)


def _value_head_stream_kernel(x_ref, w1_ref, b1_ref, w2_ref, b2_ref, o_ref, acc_ref):
    # Column-streaming path: grid = (row_blocks, H // tn).
    # x_ref: (tm, H) (block index constant along k -> revisited, not re-DMA'd)
    # w1_ref: (H, tn) slice   b1_ref/w2_ref: (1, tn) slices   acc_ref: (tm, 1) f32 scratch
    k = pl.program_id(1)

    @pl.when(k == 0)
    def _():
        acc_ref[...] = jnp.zeros_like(acc_ref)

    w1 = w1_ref[...]
    x = x_ref[...].astype(w1.dtype)
    h = jnp.dot(x, w1, preferred_element_type=jnp.float32)             # (tm, tn) MXU
    h = jnp.maximum(h + b1_ref[...], 0.0)                              # ReLU is column-wise
    acc_ref[...] += jnp.sum(h * w2_ref[...], axis=-1, keepdims=True)   # partial Linear(H,1)

    @pl.when(k == pl.num_programs(1) - 1)
    def _():
        o_ref[...] = (acc_ref[...] + b2_ref[0]).astype(o_ref.dtype)


def _default_vmem_limit():
    try:
        cap = int(getattr(pltpu.get_tpu_info(), "vmem_capacity_bytes"))
        if cap <= 0:
            raise ValueError
    except Exception:
        return 64 * 1024 * 1024            # conservative, works on all generations
    # leave ~25% headroom for compiler scratch: ~48 MiB on v7x, ~96 MiB on v5e/v6e
    return max(32 * 1024 * 1024, min(3 * cap // 4, 100 * 1024 * 1024))


def prepare_value_head_params(w1, b1, w2, b2, *, compute_dtype=jnp.bfloat16):
    """One-time parameter prep (do NOT redo per forward call).

    w1 is stored (in, out) so the kernel computes x @ w1 (== PyTorch Linear with weight.T).
    W1 is cast to compute_dtype (bf16 default) for the MXU; b1/w2/b2 stay f32.
    """
    H = w1.shape[0]
    assert w1.shape == (H, H)
    w1c = jnp.asarray(w1).astype(compute_dtype)
    b1_row = jnp.asarray(b1, jnp.float32).reshape(1, H)
    w2_row = jnp.asarray(w2, jnp.float32).reshape(1, H)
    b2_s = jnp.asarray(b2, jnp.float32).reshape(1)
    return w1c, b1_row, w2_row, b2_s


def value_head_forward(hidden_states, params, *, tm=None, tn=None,
                       vmem_limit_bytes=None, force_stream=False):
    """hidden_states: (B, S, H) -> (B, S).  params from prepare_value_head_params."""
    w1c, b1_row, w2_row, b2_s = params
    B, S, H = hidden_states.shape
    assert w1c.shape == (H, H)
    M = B * S
    out_dtype = jnp.dtype(hidden_states.dtype)
    x2d = hidden_states.reshape(M, H)   # no pad, no cast: single HBM read inside the kernel

    if vmem_limit_bytes is None:
        vmem_limit_bytes = _default_vmem_limit()

    if tm is None:
        # target >=2 row blocks (both TCs on v7x busy), multiples of 128, cap at 512
        tm = min(512, max(128, ((pl.cdiv(M, 2) + 127) // 128) * 128))
    assert tm % 16 == 0, "tm must be a multiple of 16 (multiples of 128 recommended)"
    n_blocks = pl.cdiv(M, tm)

    w1_bytes = H * H * jnp.dtype(w1c.dtype).itemsize
    stream = force_stream or (w1_bytes > vmem_limit_bytes // 3)

    cost = pl.CostEstimate(
        flops=2 * M * H * H + 3 * M * H,
        transcendentals=0,
        bytes_accessed=int(M * H * x2d.dtype.itemsize + w1_bytes
                           + (2 * H + 1) * 4 + M * out_dtype.itemsize),
    )

    if not stream:
        grid_spec = pltpu.PrefetchScalarGridSpec(
            num_scalar_prefetch=0,
            grid=(n_blocks,),
            in_specs=[
                pl.BlockSpec((tm, H), lambda i: (i, 0)),             # x row tile (pipelined)
                pl.BlockSpec(memory_space=pltpu.MemorySpace.VMEM),   # W1 resident, single copy
                pl.BlockSpec(memory_space=pltpu.MemorySpace.VMEM),   # b1
                pl.BlockSpec(memory_space=pltpu.MemorySpace.VMEM),   # w2
                pl.BlockSpec(memory_space=pltpu.MemorySpace.SMEM),   # b2 scalar
            ],
            out_specs=pl.BlockSpec((tm, 1), lambda i: (i, 0)),
        )
        kernel = _value_head_resident_kernel
        dims = ("parallel",)
    else:
        if tn is None:
            tn = next((t for t in (512, 256, 128) if H % t == 0), H)
        assert H % tn == 0, "streaming needs tn | H (padded columns would be reduced over)"
        grid_spec = pltpu.PrefetchScalarGridSpec(
            num_scalar_prefetch=0,
            grid=(n_blocks, H // tn),
            in_specs=[
                pl.BlockSpec((tm, H), lambda i, k: (i, 0)),          # x (revisited along k)
                pl.BlockSpec((H, tn), lambda i, k: (0, k)),          # W1 column slice (streamed)
                pl.BlockSpec((1, tn), lambda i, k: (0, k)),          # b1 slice
                pl.BlockSpec((1, tn), lambda i, k: (0, k)),          # w2 slice
                pl.BlockSpec(memory_space=pltpu.MemorySpace.SMEM),   # b2 scalar
            ],
            out_specs=pl.BlockSpec((tm, 1), lambda i, k: (i, 0)),
            scratch_shapes=[pltpu.VMEM((tm, 1), jnp.float32)],
        )
        kernel = _value_head_stream_kernel
        dims = ("parallel", "arbitrary")

    out2d = pl.pallas_call(
        kernel,
        out_shape=jax.ShapeDtypeStruct((M, 1), out_dtype),
        grid_spec=grid_spec,
        compiler_params=pltpu.CompilerParams(
            dimension_semantics=dims,
            vmem_limit_bytes=vmem_limit_bytes,
        ),
        cost_estimate=cost,
    )(x2d, w1c, b1_row, w2_row, b2_s)

    return out2d.reshape(B, S)   # squeeze(-1) semantics


def make_params(key, hidden_size):
    """Synthetic init mimicking nn.Linear; W1 stored (in, out) for x @ W1."""
    k1, k2, k3, k4 = jax.random.split(key, 4)
    bound = 1.0 / jnp.sqrt(hidden_size)
    w1 = jax.random.uniform(k1, (hidden_size, hidden_size), jnp.float32, -bound, bound)
    b1 = jax.random.uniform(k2, (hidden_size,), jnp.float32, -bound, bound)
    w2 = jax.random.uniform(k3, (hidden_size,), jnp.float32, -bound, bound)
    b2 = jax.random.uniform(k4, (1,), jnp.float32, -bound, bound)
    return w1, b1, w2, b2


if __name__ == "__main__":
    key = jax.random.PRNGKey(0)
    k_x, k_p, k_x2, k_p2, k_x3 = jax.random.split(key, 5)

    def reference(x, w1, b1, w2, b2):
        B, S, H = x.shape
        h = jnp.maximum(x.reshape(-1, H) @ w1 + b1, 0.0)
        return (h @ w2 + b2[0]).reshape(B, S)

    batch, seq, hidden = 2, 8, 32
    hs = jax.random.normal(k_x, (batch, seq, hidden), jnp.float32)
    w1, b1, w2, b2 = make_params(k_p, hidden)

    # 1) f32 MXU operands: tight tolerance (resident path, single partial block).
    p_f32 = prepare_value_head_params(w1, b1, w2, b2, compute_dtype=jnp.float32)
    out = jax.block_until_ready(value_head_forward(hs, p_f32))
    assert out.shape == (batch, seq), out.shape
    assert jnp.allclose(out, reference(hs, w1, b1, w2, b2), atol=1e-5, rtol=1e-5)

    # 2) default bf16 MXU operands with f32 accumulation: looser tolerance.
    p_bf16 = prepare_value_head_params(w1, b1, w2, b2)
    out_bf = jax.block_until_ready(value_head_forward(hs, p_bf16))
    assert jnp.allclose(out_bf, reference(hs, w1, b1, w2, b2), atol=5e-2, rtol=5e-2)

    # 3) multi-block row grid with a trailing partial block (M=300, tm=128), no wrapper pad.
    hs2 = jax.random.normal(k_x2, (3, 100, hidden), jnp.float32)
    out2 = jax.block_until_ready(value_head_forward(hs2, p_f32, tm=128))
    assert out2.shape == (3, 100), out2.shape
    assert jnp.allclose(out2, reference(hs2, w1, b1, w2, b2), atol=1e-5, rtol=1e-5)

    # 4) W1 column-streaming path (auto-selected for large H / v7x VMEM); forced here at H=256.
    hidden2 = 256
    w1b, b1b, w2b, b2b = make_params(k_p2, hidden2)
    hs3 = jax.random.normal(k_x3, (2, 24, hidden2), jnp.float32)
    p2 = prepare_value_head_params(w1b, b1b, w2b, b2b, compute_dtype=jnp.float32)
    out3 = jax.block_until_ready(value_head_forward(hs3, p2, force_stream=True, tn=128))
    assert out3.shape == (2, 24), out3.shape
    assert jnp.allclose(out3, reference(hs3, w1b, b1b, w2b, b2b), atol=1e-3, rtol=1e-3)

    print("KERNEL_OK")
</pallas_src>

<mosaic_0001>
module attributes {stable_mosaic.version = 11 : i64} {
  func.func @_value_head_resident_kernel(%arg0: i32, %arg1: memref<128x32xf32, #tpu.memory_space<vmem>>, %arg2: memref<32x32xf32, #tpu.memory_space<vmem>>, %arg3: memref<1x32xf32, #tpu.memory_space<vmem>>, %arg4: memref<1x32xf32, #tpu.memory_space<vmem>>, %arg5: memref<1xf32, #tpu.memory_space<smem>>, %arg6: memref<128x1xf32, #tpu.memory_space<vmem>>) attributes {dimension_semantics = [#tpu.dimension_semantics<parallel>], iteration_bounds = array<i64: 1>, scalar_prefetch = 0 : i64, scratch_operands = 0 : i64, tpu.core_type = #tpu.core_type<tc>, window_params = [{transform_indices = @transform_0, window_bounds = array<i64: 128, 32>}, {pipeline_mode = #tpu.pipeline_mode<synchronous>, transform_indices = @transform_1, window_bounds = array<i64: 32, 32>}, {pipeline_mode = #tpu.pipeline_mode<synchronous>, transform_indices = @transform_2, window_bounds = array<i64: 1, 32>}, {pipeline_mode = #tpu.pipeline_mode<synchronous>, transform_indices = @transform_3, window_bounds = array<i64: 1, 32>}, {transform_indices = @transform_4, window_bounds = array<i64: 1>}, {transform_indices = @transform_5, window_bounds = array<i64: 128, 1>}]} {
    %c0 = arith.constant 0 : index
    %c0_0 = arith.constant 0 : index
    %0 = vector.load %arg2[%c0, %c0_0] : memref<32x32xf32, #tpu.memory_space<vmem>>, vector<32x32xf32>
    %c0_1 = arith.constant 0 : index
    %c0_2 = arith.constant 0 : index
    %1 = vector.load %arg3[%c0_1, %c0_2] : memref<1x32xf32, #tpu.memory_space<vmem>>, vector<1x32xf32>
    %c0_3 = arith.constant 0 : index
    %c0_4 = arith.constant 0 : index
    %2 = vector.load %arg4[%c0_3, %c0_4] : memref<1x32xf32, #tpu.memory_space<vmem>>, vector<1x32xf32>
    %c0_5 = arith.constant 0 : index
    %3 = memref.load %arg5[%c0_5] : memref<1xf32, #tpu.memory_space<smem>>
    %c0_6 = arith.constant 0 : index
    %c0_7 = arith.constant 0 : index
    %4 = vector.load %arg1[%c0_6, %c0_7] : memref<128x32xf32, #tpu.memory_space<vmem>>, vector<64x32xf32>
    %cst = arith.constant dense<0.000000e+00> : vector<64x32xf32>
    %5 = tpu.matmul %4, %0, %cst {dimension_numbers = #tpu.dot_dimension_numbers<[1], [0], [0], [1], [0, 0, 1, 1], [], []>} : vector<64x32xf32>, vector<32x32xf32>, vector<64x32xf32> -> vector<64x32xf32>
    %6 = vector.broadcast %1 : vector<1x32xf32> to vector<64x32xf32>
    %7 = arith.addf %5, %6 : vector<64x32xf32>
    %cst_8 = arith.constant 0.000000e+00 : f32
    %8 = vector.broadcast %cst_8 : f32 to vector<64x32xf32>
    %9 = arith.maximumf %7, %8 : vector<64x32xf32>
    %10 = vector.broadcast %2 : vector<1x32xf32> to vector<64x32xf32>
    %11 = arith.mulf %9, %10 : vector<64x32xf32>
    %cst_9 = arith.constant dense<0.000000e+00> : vector<64xf32>
    %12 = vector.multi_reduction <add>, %11, %cst_9 [1] : vector<64x32xf32> to vector<64xf32>
    %13 = vector.shape_cast %12 : vector<64xf32> to vector<64x1xf32>
    %14 = vector.broadcast %3 : f32 to vector<64x1xf32>
    %15 = arith.addf %13, %14 : vector<64x1xf32>
    %c0_10 = arith.constant 0 : index
    %c0_11 = arith.constant 0 : index
    %16 = vector.load %arg6[%c0_10, %c0_11] : memref<128x1xf32, #tpu.memory_space<vmem>>, vector<64x1xf32>
    tpu.vector_store %arg6[%c0_10, %c0_11], %15 {strides = array<i32>} : memref<128x1xf32, #tpu.memory_space<vmem>>, vector<64x1xf32>,
    %c64 = arith.constant 64 : index
    %c0_12 = arith.constant 0 : index
    %17 = vector.load %arg1[%c64, %c0_12] : memref<128x32xf32, #tpu.memory_space<vmem>>, vector<64x32xf32>
    %cst_13 = arith.constant dense<0.000000e+00> : vector<64x32xf32>
    %18 = tpu.matmul %17, %0, %cst_13 {dimension_numbers = #tpu.dot_dimension_numbers<[1], [0], [0], [1], [0, 0, 1, 1], [], []>} : vector<64x32xf32>, vector<32x32xf32>, vector<64x32xf32> -> vector<64x32xf32>
    %19 = vector.broadcast %1 : vector<1x32xf32> to vector<64x32xf32>
    %20 = arith.addf %18, %19 : vector<64x32xf32>
    %cst_14 = arith.constant 0.000000e+00 : f32
    %21 = vector.broadcast %cst_14 : f32 to vector<64x32xf32>
    %22 = arith.maximumf %20, %21 : vector<64x32xf32>
    %23 = vector.broadcast %2 : vector<1x32xf32> to vector<64x32xf32>
    %24 = arith.mulf %22, %23 : vector<64x32xf32>
    %cst_15 = arith.constant dense<0.000000e+00> : vector<64xf32>
    %25 = vector.multi_reduction <add>, %24, %cst_15 [1] : vector<64x32xf32> to vector<64xf32>
    %26 = vector.shape_cast %25 : vector<64xf32> to vector<64x1xf32>
    %27 = vector.broadcast %3 : f32 to vector<64x1xf32>
    %28 = arith.addf %26, %27 : vector<64x1xf32>
    %c64_16 = arith.constant 64 : index
    %c0_17 = arith.constant 0 : index
    %29 = vector.load %arg6[%c64_16, %c0_17] : memref<128x1xf32, #tpu.memory_space<vmem>>, vector<64x1xf32>
    tpu.vector_store %arg6[%c64_16, %c0_17], %28 {strides = array<i32>} : memref<128x1xf32, #tpu.memory_space<vmem>>, vector<64x1xf32>,
    return
  }
  func.func @transform_0(%arg0: i32) -> (i32, i32) {
    %c0_i32 = arith.constant 0 : i32
    %c0_i32_0 = arith.constant 0 : i32
    return %arg0, %c0_i32 : i32, i32
  }
  func.func @transform_1(%arg0: i32) -> (i32, i32) {
    %c0_i32 = arith.constant 0 : i32
    %c0_i32_0 = arith.constant 0 : i32
    %c0_i32_1 = arith.constant 0 : i32
    return %c0_i32, %c0_i32_0 : i32, i32
  }
  func.func @transform_2(%arg0: i32) -> (i32, i32) {
    %c0_i32 = arith.constant 0 : i32
    %c0_i32_0 = arith.constant 0 : i32
    %c0_i32_1 = arith.constant 0 : i32
    return %c0_i32, %c0_i32_0 : i32, i32
  }
  func.func @transform_3(%arg0: i32) -> (i32, i32) {
    %c0_i32 = arith.constant 0 : i32
    %c0_i32_0 = arith.constant 0 : i32
    %c0_i32_1 = arith.constant 0 : i32
    return %c0_i32, %c0_i32_0 : i32, i32
  }
  func.func @transform_4(%arg0: i32) -> i32 {
    %c0_i32 = arith.constant 0 : i32
    %c0_i32_0 = arith.constant 0 : i32
    return %c0_i32 : i32
  }
  func.func @transform_5(%arg0: i32) -> (i32, i32) {
    %c0_i32 = arith.constant 0 : i32
    %c0_i32_0 = arith.constant 0 : i32
    return %arg0, %c0_i32 : i32, i32
  }
}

</mosaic_0001>

<bundles_post_ra>
// kernel: tpu_custom_call.1
= control target key start
LH: loop header
LB: loop body
LE: loop exit
PB: predicated region body
PF: predicated region fallthrough
CT: control target
= control target key end

     0   :  { %11 = vsyncpa [#allocation4], 0  ;;  %s924_s0 = inlined_call_operand.hbm [shape: f32[16,32], index: 0, kind: input, shape index: {}]   ;;  %s925_s1 = inlined_call_operand.hbm [shape: f32[32,32], index: 1, kind: input, shape index: {}]   ;;  %s926_s2 = inlined_call_operand.hbm [shape: f32[1,32], index: 2, kind: input, shape index: {}]   ;;  %s927_s3 = inlined_call_operand.hbm [shape: f32[1,32], index: 3, kind: input, shape index: {}]   ;;  %s928_s4 = inlined_call_operand.<no memory space> [shape: f32[1], index: 4, kind: input, shape index: {}]   ;;  %s929_s5 = inlined_call_operand.hbm [shape: f32[16,1], index: 5, kind: output, shape index: {}]  }
   0x1   :  { %12 = vsyncpa [#allocation7], 0 }
   0x2   :  { %13 = vsyncpa [#allocation10], 0 }
   0x3   :  { %14 = vsyncpa [#allocation5], 0 }
   0x4   :  { %19 = vsyncadd [#allocation4], 1792  ;;  %s723_s18 = smov [#allocation6]   ;;  %s724_s20 = smov [#allocation3]  }
   0x5   :  { %s32_s19 = sshll.u32 %s723_s18, 4  ;;  %s20_s21 = sshll.u32 %s724_s20, 4  ;;  %s33_s19 = int_to_ptr.vmem [resolvable:$true] %s32_s19  ;;  %s760_s21 = int_to_ptr.vmem [resolvable:$true] %s20_s21 }
   0x6   :  { %s605_s24 = scalar_lea.hbm %s925_s1, 512 }
   0x7   :  { %p606_p0 = scmp.ne.s32.totalorder %s925_s1, %s605_s24  ;;  %p609_p1 = scmp.lt.u32.totalorder %s605_s24, %s925_s1 }
   0x9   :  { %p611_p2 = pnand %p609_p1, %p606_p0 }
   0xb   :  { %614 = shalt.err (!%p611_p2)
}
   0xc   :  { %s615_s29 = scalar_lea.vmem %s33_s19, 512  ;;  %p620_p4 = scmp.lt.s32.totalorder %s33_s19, %s33_s19 }
   0xd   :  { %p616_p3 = scmp.ne.s32.totalorder %s33_s19, %s615_s29  ;;  %p621_p5 = scmp.lt.s32.totalorder %s615_s29, %s615_s29 }
   0xf   :  { %p622_p6 = por %p621_p5, %p620_p4 }
  0x11   :  { %p623_p7 = pnand %p622_p6, %p616_p3 }
  0x13   :  { %626 = shalt.err (!%p623_p7)
}
  0x14   :  { %s725_s30 = smov 128   ;;  %s726_s6 = smov 8  }
  0x15   :  { %38 = dma.hbm_to_vmem [thread:$0]  %s925_s1, 512, %s33_s19, [#allocation7], %s725_s30, %s725_s30, %s726_s6  }
  0x16   :  { %s627_s11 = scalar_lea.hbm %s924_s0, 256 }
  0x17   :  { %p628_p8 = scmp.ne.s32.totalorder %s924_s0, %s627_s11  ;;  %p631_p9 = scmp.lt.u32.totalorder %s627_s11, %s924_s0 }
  0x19   :  { %p633_p10 = pnand %p631_p9, %p628_p8 }
  0x1b   :  { %636 = shalt.err (!%p633_p10)
}
  0x1c   :  { %s637_s16 = scalar_lea.vmem %s760_s21, 256  ;;  %s641_s1 = scalar_lea.vmem %s760_s21, 2048 }
  0x1d   :  { %p638_p11 = scmp.ne.s32.totalorder %s760_s21, %s637_s16  ;;  %p642_p12 = scmp.lt.s32.totalorder %s760_s21, %s760_s21 }
  0x1e   :  { %p643_p13 = scmp.lt.s32.totalorder %s641_s1, %s637_s16 }
  0x20   :  { %p644_p0 = por %p643_p13, %p642_p12 }
  0x22   :  { %p645_p1 = pnand %p644_p0, %p638_p11 }
  0x24   :  { %648 = shalt.err (!%p645_p1)
}
  0x25   :  { %26 = dma.hbm_to_vmem [thread:$0]  %s924_s0, 256, %s760_s21, [#allocation4], %s725_s30, %s725_s30, %s726_s6  }
  0x26   :  { %s727_s19 = smov [#allocation8]   ;;  %s728_s22 = smov [#allocation9]  }
  0x27   :  { %s45_s20 = sshll.u32 %s727_s19, 4  ;;  %s55_s23 = sshll.u32 %s728_s22, 4  ;;  %s46_s20 = int_to_ptr.vmem [resolvable:$true] %s45_s20  ;;  %s56_s23 = int_to_ptr.vmem [resolvable:$true] %s55_s23 }
  0x28   :  { %s649_s26 = scalar_lea.hbm %s926_s2, 16 }
  0x29   :  { %p650_p2 = scmp.ne.s32.totalorder %s926_s2, %s649_s26  ;;  %p653_p3 = scmp.lt.u32.totalorder %s649_s26, %s926_s2 }
  0x2b   :  { %p655_p4 = pnand %p653_p3, %p650_p2 }
  0x2d   :  { %658 = shalt.err (!%p655_p4)
}
  0x2e   :  { %s659_s0 = scalar_lea.vmem %s46_s20, 16  ;;  %s663_s21 = scalar_lea.vmem %s46_s20, 32 }
  0x2f   :  { %p660_p5 = scmp.ne.s32.totalorder %s46_s20, %s659_s0  ;;  %p664_p6 = scmp.lt.s32.totalorder %s46_s20, %s46_s20 }
  0x30   :  { %p665_p7 = scmp.lt.s32.totalorder %s663_s21, %s659_s0 }
  0x32   :  { %p666_p8 = por %p665_p7, %p664_p6 }
  0x34   :  { %p667_p9 = pnand %p666_p8, %p660_p5 }
  0x36   :  { %670 = shalt.err (!%p667_p9)
}
  0x37   :  { %48 = dma.hbm_to_vmem [thread:$0]  %s926_s2, 16, %s46_s20, [#allocation7]  }
  0x38   :  { %s671_s12 = scalar_lea.hbm %s927_s3, 16 }
  0x39   :  { %p672_p10 = scmp.ne.s32.totalorder %s927_s3, %s671_s12  ;;  %p675_p11 = scmp.lt.u32.totalorder %s671_s12, %s927_s3 }
  0x3b   :  { %p677_p12 = pnand %p675_p11, %p672_p10 }
  0x3d   :  { %680 = shalt.err (!%p677_p12)
}
  0x3e   :  { %s681_s1 = scalar_lea.vmem %s56_s23, 16  ;;  %s685_s17 = scalar_lea.vmem %s56_s23, 32 }
  0x3f   :  { %p682_p13 = scmp.ne.s32.totalorder %s56_s23, %s681_s1  ;;  %p686_p0 = scmp.lt.s32.totalorder %s56_s23, %s56_s23 }
  0x40   :  { %p687_p1 = scmp.lt.s32.totalorder %s685_s17, %s681_s1 }
  0x42   :  { %p688_p2 = por %p687_p1, %p686_p0 }
  0x44   :  { %p689_p3 = pnand %p688_p2, %p682_p13 }
  0x46   :  { %692 = shalt.err (!%p689_p3)
}
  0x47   :  { %58 = dma.hbm_to_vmem [thread:$0]  %s927_s3, 16, %s56_s23, [#allocation10]  }
  0x48   :  { %715 = dma.done.wait [#allocation4], 2048  }
  0x49   :  { %716 = vsyncadd [#allocation4], 4294965248 }
  0x4a   :  { %717 = dma.done.wait [#allocation7], 528  }
  0x4b   :  { %718 = vsyncadd [#allocation7], 4294966768 }
  0x4c   :  { %719 = dma.done.wait [#allocation10], 16  }
  0x4d   :  { %720 = vsyncadd [#allocation10], 4294967280  ;;  %vm94_vm0 = vcmask 261120   ;;  %v73_v0 = vld [vmem:[#allocation6] sm:$0xff]  ;;  %v74_v1 = vld [vmem:[#allocation6 + $0x8] sm:$0xff]  ;;  %vm279_vm1 = vcmask 7168  }
  0x4e   :  { %v75_v2 = vld [vmem:[#allocation6 + $0x10] sm:$0xff]  ;;  %v582_v3 = vpack.c.bf16 %v74_v1, %v73_v0  ;;  %v76_v4 = vld [vmem:[#allocation6 + $0x18] sm:$0xff]  ;;  %v80_v5 = vld [vmem:[#allocation3] sm:$0xff] }
  0x4f   :  { %v288_v6 = vld [vmem:[#allocation3 + $0x40] sm:$0xff]  ;;  %v586_v7 = vpack.c.bf16 %v76_v4, %v75_v2  ;;  %550 = vmatprep.mubr.msk.f32.mxu0 %vm94_vm0, %v80_v5  ;;  %v81_v8 = vld [vmem:[#allocation3 + $0x8] sm:$0xff]  ;;  %v82_v10 = vld [vmem:[#allocation3 + $0x10] sm:$0xff] }
  0x50   :  { %570 = vmatprep.mubr.msk.f32.mxu1 %vm94_vm0, %v288_v6  ;;  %583 = vmatprep.subr.bf16.mxu0 %v582_v3  ;;  %v289_v9 = vld [vmem:[#allocation3 + $0x48] sm:$0xff]  ;;  %v290_v11 = vld [vmem:[#allocation3 + $0x50] sm:$0xff]  ;;  %v83_v12 = vld [vmem:[#allocation3 + $0x18] sm:$0xff] }
  0x51   :  { %591 = vmatprep.subr.bf16.mxu1 %v582_v3  ;;  %585 = vmatpush3.bf16.msra.mxu0 %v582_v3  ;;  %v291_v13 = vld [vmem:[#allocation3 + $0x58] sm:$0xff]  ;;  %v84_v14 = vld [vmem:[#allocation3 + $0x20] sm:$0xff]  ;;  %v85_v16 = vld [vmem:[#allocation3 + $0x28] sm:$0xff] }
  0x52   :  { %593 = vmatpush3.bf16.msra.mxu1 %v582_v3  ;;  %587 = vmatprep.subr.bf16.mxu0 %v586_v7  ;;  %v292_v15 = vld [vmem:[#allocation3 + $0x60] sm:$0xff]  ;;  %v293_v17 = vld [vmem:[#allocation3 + $0x68] sm:$0xff]  ;;  %v86_v18 = vld [vmem:[#allocation3 + $0x30] sm:$0xff] }
  0x53   :  { %595 = vmatprep.subr.bf16.mxu1 %v586_v7  ;;  %v294_v19 = vld [vmem:[#allocation3 + $0x70] sm:$0xff]  ;;  %v87_v20 = vld [vmem:[#allocation3 + $0x38] sm:$0xff]  ;;  %v838_v22 = vld [vmem:[#allocation8] ss:$0 sm:$0xff] }
  0x54   :  { %v295_v21 = vld [vmem:[#allocation3 + $0x78] sm:$0xff]  ;;  %v844_v31 = vld [vmem:[#allocation9] ss:$0 sm:$0xff] }
  0x55   :  { %589 = vmatpush3.bf16.msra.mxu0 %v586_v7 }
  0x56   :  { %597 = vmatpush3.bf16.msra.mxu1 %v586_v7 }
  0x58   :  { %551 = vmatmul.mubr.msk.f32.vlgmr.msra.gmra.mrb[0].mxu0 %vm94_vm0, %v81_v8 }
  0x59   :  { %571 = vmatmul.mubr.msk.f32.vlgmr.msra.gmra.mrb[0].mxu1 %vm94_vm0, %v289_v9  ;;  %553 = vmatprep.mubr.msk.f32.mxu0 %vm94_vm0, %v82_v10 }
  0x5a   :  { %573 = vmatprep.mubr.msk.f32.mxu1 %vm94_vm0, %v290_v11 }
  0x5c   :  { %554 = vmatmul.mubr.msk.f32.gmra.mrb[2].mxu0 %vm94_vm0, %v83_v12 }
  0x5d   :  { %574 = vmatmul.mubr.msk.f32.gmra.mrb[2].mxu1 %vm94_vm0, %v291_v13  ;;  %556 = vmatprep.mubr.msk.f32.mxu0 %vm94_vm0, %v84_v14 }
  0x5e   :  { %576 = vmatprep.mubr.msk.f32.mxu1 %vm94_vm0, %v292_v15 }
  0x60   :  { %557 = vmatmul.mubr.msk.f32.gmra.mrb[4].mxu0 %vm94_vm0, %v85_v16 }
  0x61   :  { %577 = vmatmul.mubr.msk.f32.gmra.mrb[4].mxu1 %vm94_vm0, %v293_v17  ;;  %559 = vmatprep.mubr.msk.f32.mxu0 %vm94_vm0, %v86_v18 }
  0x62   :  { %579 = vmatprep.mubr.msk.f32.mxu1 %vm94_vm0, %v294_v19 }
  0x64   :  { %560 = vmatmul.mubr.msk.f32.gmra.mrb[6].mxu0 %vm94_vm0, %v87_v20 }
  0x65   :  { %580 = vmatmul.mubr.msk.f32.gmra.mrb[6].mxu1 %vm94_vm0, %v295_v21 }
 0x12b   :  { %v552_v23 = vpop.f32.mrb[0].mxu0 }
 0x12c   :  { %v572_v24 = vpop.f32.mrb[0].mxu1  ;;  %v191_v25 = vadd.f32 %v552_v23, %v838_v22  ;;  %v185_v27 = vpop.f32.mrb[1].mxu0 }
 0x12d   :  { %v392_v26 = vadd.f32 %v572_v24, %v838_v22  ;;  %v386_v28 = vpop.f32.mrb[1].mxu1  ;;  %v186_v29 = vadd.f32 %v838_v22, %v185_v27 }
 0x12e   :  { %v387_v30 = vadd.f32 %v838_v22, %v386_v28  ;;  %v225_v32 = vmax.f32 %v191_v25, 0.0 }
 0x12f   :  { %v426_v33 = vmax.f32 %v392_v26, 0.0  ;;  %v224_v34 = vmax.f32 %v186_v29, 0.0  ;;  %v555_v35 = vpop.f32.mrb[2].mxu0 }
 0x130   :  { %v575_v36 = vpop.f32.mrb[2].mxu1  ;;  %v201_v37 = vadd.f32 %v555_v35, %v838_v22  ;;  %v195_v38 = vpop.f32.mrb[3].mxu0  ;;  %v239_v42 = vmul.f32 %v844_v31, %v225_v32  ;;  %v425_v43 = vmax.f32 %v387_v30, 0.0 }
 0x131   :  { %v402_v39 = vadd.f32 %v575_v36, %v838_v22  ;;  %v434_v40 = vmul.f32 %v844_v31, %v426_v33  ;;  %v396_v41 = vpop.f32.mrb[3].mxu1  ;;  %v196_v44 = vadd.f32 %v838_v22, %v195_v38  ;;  %v238_v46 = vmul.f32 %v844_v31, %v224_v34 }
 0x132   :  { %v397_v45 = vadd.f32 %v838_v22, %v396_v41  ;;  %v227_v47 = vmax.f32 %v201_v37, 0.0  ;;  %v249_v50 = vsel %vm94_vm0, %v239_v42, 0.0  ;;  %v433_v59 = vmul.f32 %v844_v31, %v425_v43 }
 0x133   :  { %v428_v48 = vmax.f32 %v402_v39, 0.0  ;;  %v444_v49 = vsel %vm94_vm0, %v434_v40, 0.0  ;;  %250 = vadd.xlane.f32.xlu0 %v249_v50  ;;  %v558_v51 = vpop.f32.mrb[4].mxu0  ;;  %v226_v60 = vmax.f32 %v196_v44, 0.0  ;;  %v246_v63 = vsel %vm94_vm0, %v238_v46, 0.0 }
 0x134   :  { %445 = vadd.xlane.f32.xlu1 %v444_v49  ;;  %v578_v52 = vpop.f32.mrb[4].mxu1  ;;  %v241_v53 = vmul.f32 %v844_v31, %v227_v47  ;;  %v211_v54 = vadd.f32 %v558_v51, %v838_v22  ;;  %v205_v55 = vpop.f32.mrb[5].mxu0  ;;  %v427_v61 = vmax.f32 %v397_v45, 0.0  ;;  %v441_v9 = vsel %vm94_vm0, %v433_v59, 0.0 }
 0x135   :  { %v436_v56 = vmul.f32 %v844_v31, %v428_v48  ;;  %v406_v57 = vpop.f32.mrb[5].mxu1  ;;  %v206_v58 = vadd.f32 %v838_v22, %v205_v55  ;;  %v412_v0 = vadd.f32 %v578_v52, %v838_v22  ;;  %v240_v10 = vmul.f32 %v844_v31, %v226_v60 }
 0x136   :  { %v255_v62 = vsel %vm94_vm0, %v241_v53, 0.0  ;;  %v407_v1 = vadd.f32 %v838_v22, %v406_v57  ;;  %v229_v4 = vmax.f32 %v211_v54, 0.0  ;;  %v435_v11 = vmul.f32 %v844_v31, %v427_v61 }
 0x137   :  { %247 = vadd.xlane.f32.xlu0 %v246_v63  ;;  %v561_v2 = vpop.f32.mrb[6].mxu0  ;;  %v228_v5 = vmax.f32 %v206_v58, 0.0  ;;  %v450_v6 = vsel %vm94_vm0, %v436_v56, 0.0  ;;  %v430_v12 = vmax.f32 %v412_v0, 0.0  ;;  %v252_v18 = vsel %vm94_vm0, %v240_v10, 0.0 }
 0x138   :  { %256 = vadd.xlane.f32.xlu1 %v255_v62  ;;  %v581_v3 = vpop.f32.mrb[6].mxu1  ;;  %v215_v7 = vpop.f32.mrb[7].mxu0  ;;  %v429_v13 = vmax.f32 %v407_v1, 0.0  ;;  %v221_v14 = vadd.f32 %v561_v2, %v838_v22  ;;  %v243_v16 = vmul.f32 %v844_v31, %v229_v4  ;;  %v447_v19 = vsel %vm94_vm0, %v435_v11, 0.0 }
 0x139   :  { %v416_v8 = vpop.f32.mrb[7].mxu1  ;;  %v216_v15 = vadd.f32 %v838_v22, %v215_v7  ;;  %v242_v17 = vmul.f32 %v844_v31, %v228_v5  ;;  %v422_v20 = vadd.f32 %v581_v3, %v838_v22  ;;  %v438_v23 = vmul.f32 %v844_v31, %v430_v12 }
 0x13a   :  { %v417_v21 = vadd.f32 %v838_v22, %v416_v8  ;;  %v437_v24 = vmul.f32 %v844_v31, %v429_v13  ;;  %v231_v25 = vmax.f32 %v221_v14, 0.0  ;;  %v261_v27 = vsel %vm94_vm0, %v243_v16, 0.0 }
 0x13b   :  { %442 = vadd.xlane.f32.xlu0 %v441_v9  ;;  %v230_v26 = vmax.f32 %v216_v15, 0.0  ;;  %v258_v28 = vsel %vm94_vm0, %v242_v17, 0.0  ;;  %v432_v29 = vmax.f32 %v422_v20, 0.0  ;;  %v456_v30 = vsel %vm94_vm0, %v438_v23, 0.0 }
 0x13c   :  { %451 = vadd.xlane.f32.xlu1 %v450_v6  ;;  %v431_v32 = vmax.f32 %v417_v21, 0.0  ;;  %v453_v33 = vsel %vm94_vm0, %v437_v24, 0.0  ;;  %v245_v22 = vmul.f32 %v844_v31, %v231_v25  ;;  %v270_v41 = vstv %s928_s4 }
 0x13d   :  { %v244_v34 = vmul.f32 %v844_v31, %v230_v26  ;;  %v440_v37 = vmul.f32 %v844_v31, %v432_v29 }
 0x13e   :  { %v267_v35 = vsel %vm94_vm0, %v245_v22, 0.0  ;;  %v439_v38 = vmul.f32 %v844_v31, %v431_v32 }
 0x13f   :  { %448 = vadd.xlane.f32.xlu0 %v447_v19  ;;  %v264_v36 = vsel %vm94_vm0, %v244_v34, 0.0  ;;  %v462_v39 = vsel %vm94_vm0, %v440_v37, 0.0 }
 0x140   :  { %253 = vadd.xlane.f32.xlu1 %v252_v18  ;;  %v459_v40 = vsel %vm94_vm0, %v439_v38, 0.0 }
 0x143   :  { %259 = vadd.xlane.f32.xlu0 %v258_v28 }
 0x144   :  { %262 = vadd.xlane.f32.xlu1 %v261_v27 }
 0x147   :  { %454 = vadd.xlane.f32.xlu0 %v453_v33 }
 0x148   :  { %457 = vadd.xlane.f32.xlu1 %v456_v30 }
 0x14b   :  { %265 = vadd.xlane.f32.xlu0 %v264_v36 }
 0x14c   :  { %268 = vadd.xlane.f32.xlu1 %v267_v35 }
 0x14f   :  { %460 = vadd.xlane.f32.xlu0 %v459_v40 }
 0x150   :  { %463 = vadd.xlane.f32.xlu1 %v462_v39 }
 0x1c0   :  { %v251_v43 = vpop.xlane.xlu0 %250 }
 0x1c1   :  { %v446_v42 = vpop.xlane.xlu1 %445  ;;  %v272_v45 = vadd.f32 %v270_v41, %v251_v43 }
 0x1c2   :  { %v466_v44 = vadd.f32 %v446_v42, %v270_v41 }
 0x1c3   :  { %281 = vst.msk [vmem:[#allocation11 + $0x8] sm:$0xff] %vm279_vm1, %v272_v45 }
 0x1c4   :  { %474 = vst.msk [vmem:[#allocation11 + $0x48] sm:$0xff] %vm279_vm1, %v466_v44  ;;  %v248_v46 = vpop.xlane.xlu0 %247 }
 0x1c5   :  { %v257_v31 = vpop.xlane.xlu1 %256  ;;  %v271_v48 = vadd.f32 %v270_v41, %v248_v46 }
 0x1c6   :  { %v274_v47 = vadd.f32 %v270_v41, %v257_v31 }
 0x1c7   :  { %280 = vst.msk [vmem:[#allocation11] sm:$0xff] %vm279_vm1, %v271_v48 }
 0x1c8   :  { %283 = vst.msk [vmem:[#allocation11 + $0x18] sm:$0xff] %vm279_vm1, %v274_v47  ;;  %v443_v50 = vpop.xlane.xlu0 %442 }
 0x1c9   :  { %v452_v49 = vpop.xlane.xlu1 %451  ;;  %v465_v52 = vadd.f32 %v443_v50, %v270_v41 }
 0x1ca   :  { %v468_v51 = vadd.f32 %v452_v49, %v270_v41 }
 0x1cb   :  { %473 = vst.msk [vmem:[#allocation11 + $0x40] sm:$0xff] %vm279_vm1, %v465_v52 }
 0x1cc   :  { %476 = vst.msk [vmem:[#allocation11 + $0x58] sm:$0xff] %vm279_vm1, %v468_v51  ;;  %v449_v54 = vpop.xlane.xlu0 %448 }
 0x1cd   :  { %v254_v53 = vpop.xlane.xlu1 %253  ;;  %v467_v56 = vadd.f32 %v449_v54, %v270_v41 }
 0x1ce   :  { %v273_v55 = vadd.f32 %v270_v41, %v254_v53 }
 0x1cf   :  { %475 = vst.msk [vmem:[#allocation11 + $0x50] sm:$0xff] %vm279_vm1, %v467_v56 }
 0x1d0   :  { %282 = vst.msk [vmem:[#allocation11 + $0x10] sm:$0xff] %vm279_vm1, %v273_v55  ;;  %v260_v58 = vpop.xlane.xlu0 %259 }
 0x1d1   :  { %v263_v57 = vpop.xlane.xlu1 %262  ;;  %v275_v60 = vadd.f32 %v270_v41, %v260_v58 }
 0x1d2   :  { %v276_v59 = vadd.f32 %v270_v41, %v263_v57 }
 0x1d3   :  { %284 = vst.msk [vmem:[#allocation11 + $0x20] sm:$0xff] %vm279_vm1, %v275_v60 }
 0x1d4   :  { %285 = vst.msk [vmem:[#allocation11 + $0x28] sm:$0xff] %vm279_vm1, %v276_v59  ;;  %v455_v62 = vpop.xlane.xlu0 %454 }
 0x1d5   :  { %v458_v61 = vpop.xlane.xlu1 %457  ;;  %v469_v0 = vadd.f32 %v455_v62, %v270_v41 }
 0x1d6   :  { %v470_v63 = vadd.f32 %v458_v61, %v270_v41 }
 0x1d7   :  { %477 = vst.msk [vmem:[#allocation11 + $0x60] sm:$0xff] %vm279_vm1, %v469_v0 }
 0x1d8   :  { %478 = vst.msk [vmem:[#allocation11 + $0x68] sm:$0xff] %vm279_vm1, %v470_v63  ;;  %v266_v2 = vpop.xlane.xlu0 %265 }
 0x1d9   :  { %v269_v1 = vpop.xlane.xlu1 %268  ;;  %v277_v4 = vadd.f32 %v270_v41, %v266_v2 }
 0x1da   :  { %v278_v3 = vadd.f32 %v270_v41, %v269_v1 }
 0x1db   :  { %286 = vst.msk [vmem:[#allocation11 + $0x30] sm:$0xff] %vm279_vm1, %v277_v4 }
 0x1dc   :  { %287 = vst.msk [vmem:[#allocation11 + $0x38] sm:$0xff] %vm279_vm1, %v278_v3  ;;  %v461_v6 = vpop.xlane.xlu0 %460 }
 0x1dd   :  { %v464_v5 = vpop.xlane.xlu1 %463  ;;  %v471_v8 = vadd.f32 %v461_v6, %v270_v41 }
 0x1de   :  { %v472_v7 = vadd.f32 %v464_v5, %v270_v41 }
 0x1df   :  { %479 = vst.msk [vmem:[#allocation11 + $0x70] sm:$0xff] %vm279_vm1, %v471_v8 }
 0x1e0   :  { %480 = vst.msk [vmem:[#allocation11 + $0x78] sm:$0xff] %vm279_vm1, %v472_v7 }
 0x1e1   :  { %485 = vsyncadd [#allocation5], 1792  ;;  %s729_s4 = smov [#allocation11]  }
 0x1e2   :  { %s486_s20 = sshll.u32 %s729_s4, 4  ;;  %s487_s20 = int_to_ptr.vmem [resolvable:$true] %s486_s20 }
 0x1e3   :  { %s693_s22 = scalar_lea.vmem %s487_s20, 256  ;;  %s697_s23 = scalar_lea.vmem %s487_s20, 2048 }
 0x1e4   :  { %p694_p4 = scmp.ne.s32.totalorder %s487_s20, %s693_s22  ;;  %p698_p5 = scmp.lt.s32.totalorder %s487_s20, %s487_s20 }
 0x1e5   :  { %p699_p6 = scmp.lt.s32.totalorder %s697_s23, %s693_s22 }
 0x1e7   :  { %p700_p7 = por %p699_p6, %p698_p5 }
 0x1e9   :  { %p701_p8 = pnand %p700_p7, %p694_p4 }
 0x1eb   :  { %704 = shalt.err (!%p701_p8)
}
 0x1ec   :  { %s705_s26 = scalar_lea.hbm %s929_s5, 256 }
 0x1ed   :  { %p706_p9 = scmp.ne.s32.totalorder %s929_s5, %s705_s26  ;;  %p709_p10 = scmp.lt.u32.totalorder %s705_s26, %s929_s5 }
 0x1ef   :  { %p711_p11 = pnand %p709_p10, %p706_p9 }
 0x1f1   :  { %714 = shalt.err (!%p711_p11)
}
 0x1f2   :  { %492 = dma.vmem_to_hbm [thread:$0]  %s487_s20, 256, %s929_s5, [#allocation5], %s725_s30, %s725_s30, %s726_s6  }
 0x1f3   :  { %721 = dma.done.wait [#allocation5], 2048  }
 0x1f4   :  { %722 = vsyncadd [#allocation5], 4294965248 }
 0x1f5   :  { %496 = vsyncpa [#allocation4], 1 }
 0x1f6   :  { %497 = vsyncpa [#allocation7], 1 }
 0x1f7   :  { %498 = vsyncpa [#allocation10], 1 }
 0x1f8   :  { %499 = vsyncpa [#allocation5], 1 }

</bundles_post_ra>
